<compile_context>
chip_gen: v5e
topology: v5e:2x2
jax: 0.10.0
libtpu: 0.0.40
codegen_flags: <defaults>
</compile_context>

<pallas_src>
import jax
import jax.numpy as jnp
from jax import lax
from jax.experimental import pallas as pl
from jax.experimental.pallas import tpu as pltpu


_LANE = 128
_SUBLANE = 8
_MAX_TILE_N = 2048          # base lane-tile cap
_MAX_TILE_N_WIDE = 8192     # cap when widening for small batches
_MAX_TILE_B = 512           # keeps the in-kernel unrolled row-reduce short


def _round_down(x, m):
    return (x // m) * m


def _block_elem_budget():
    """Per-array f32 elements per block, tuned per TPU generation."""
    try:
        kind = jax.devices()[0].device_kind.lower()
    except Exception:
        kind = ""
    if "v7" in kind or "tpu7" in kind:
        return 1024 * 1024      # ~4 MiB/array: amortize per-step overhead vs 3.2 TB/s HBM
    if "v6" in kind:
        return 512 * 1024       # ~2 MiB/array
    return 256 * 1024           # v5e / unknown: ~1 MiB/array (fits 16 MiB scoped default)


def _pick_tiles(B, N):
    budget = _block_elem_budget()

    # Lane (last) dim: multiple of 128, or the full dim when N < 128.
    if N >= _LANE:
        n_aligned = _round_down(N, _LANE)
        tile_n = min(n_aligned, _MAX_TILE_N)
    else:
        n_aligned = N
        tile_n = N

    # Row dim: multiple of 8 and <= B, or the full dim when B < 8.
    if B >= _SUBLANE:
        max_tile_b = max(_SUBLANE, _round_down(budget // max(tile_n, 1), _SUBLANE))
        tile_b = min(_round_down(B, _SUBLANE), max_tile_b, _MAX_TILE_B)
    else:
        tile_b = B

    # Small batch: spend leftover budget on wider lane tiles (fewer grid steps).
    if N >= _LANE and tile_n < n_aligned and tile_b * tile_n < budget:
        wide = _round_down(budget // max(tile_b, 1), _LANE)
        tile_n = max(tile_n, min(n_aligned, wide, _MAX_TILE_N_WIDE))

    nb = pl.cdiv(B, tile_b)
    nn = pl.cdiv(N, tile_n)

    # v7x has two TensorCores: make sure there are >=2 parallel grid steps when
    # the problem is big enough to matter (harmless no-op on v5e/v6e).
    if nb * nn == 1 and tile_b * tile_n >= 16 * 1024:
        if tile_n >= 2 * _LANE:
            tile_n = ((tile_n // 2 + _LANE - 1) // _LANE) * _LANE
        elif tile_b >= 2 * _SUBLANE:
            tile_b = ((tile_b // 2 + _SUBLANE - 1) // _SUBLANE) * _SUBLANE
        nb = pl.cdiv(B, tile_b)
        nn = pl.cdiv(N, tile_n)

    rows_out = _SUBLANE if tile_b % _SUBLANE == 0 else tile_b
    lane_out = _LANE if tile_n % _LANE == 0 else tile_n
    return tile_b, tile_n, nb, nn, rows_out, lane_out


def _make_noise_mse_kernel(B, N, tile_b, tile_n, rows_out, lane_out):
    groups = tile_b // rows_out
    chunks = tile_n // lane_out
    needs_row_mask = (B % tile_b) != 0
    needs_col_mask = (N % tile_n) != 0

    def kernel(scales_ref, x_ref, e_ref, part_ref):
        scales = scales_ref[...].astype(jnp.float32)        # (tile_b, 2)
        a = scales[:, 0:1]                                   # sqrt(alpha_hat[t])
        s = scales[:, 1:2]                                   # sqrt(1 - alpha_hat[t])
        x = x_ref[...].astype(jnp.float32)                   # (tile_b, tile_n)
        e = e_ref[...].astype(jnp.float32)                   # (tile_b, tile_n)

        # noise_images: per-row scales broadcast over lanes (pure VPU work).
        noisy = a * x + s * e
        # TODO(synk): STKDiff not provided -> identity stand-in for the denoiser.
        predicted = noisy

        d = e - predicted
        d2 = d * d

        # Ragged edge tiles: zero out-of-range rows/cols so they add nothing
        # (select, not multiply, so garbage block padding can never leak in).
        mask = None
        if needs_row_mask:
            rows_valid = B - pl.program_id(0) * tile_b
            rid = lax.broadcasted_iota(jnp.int32, (tile_b, tile_n), 0)
            mask = rid < rows_valid
        if needs_col_mask:
            cols_valid = N - pl.program_id(1) * tile_n
            cid = lax.broadcasted_iota(jnp.int32, (tile_b, tile_n), 1)
            cmask = cid < cols_valid
            mask = cmask if mask is None else (mask & cmask)
        if mask is not None:
            d2 = jnp.where(mask, d2, 0.0)

        # Rows: (tile_b, tile_n) -> (rows_out, tile_n) via 8-sublane-aligned adds.
        acc = d2[0:rows_out, :]
        for g in range(1, groups):
            acc = acc + d2[g * rows_out:(g + 1) * rows_out, :]

        # Lanes: (rows_out, tile_n) -> (rows_out, lane_out) via 128-lane-aligned adds,
        # so the partial-sum writeback stays tiny even for small batch tiles.
        out = acc[:, 0:lane_out]
        for c in range(1, chunks):
            out = out + acc[:, c * lane_out:(c + 1) * lane_out]

        part_ref[...] = out

    return kernel


def stk_noise_mse_loss(observed_data, eps, sqrt_alpha_hat_t, sqrt_one_minus_alpha_hat_t):
    """STK_base.calc_loss body (noise_images + MSE vs eps) with the denoiser
    stubbed to identity.  Returns only the scalar loss, like forward()."""
    B, K, L = observed_data.shape
    N = K * L

    x2 = observed_data.reshape(B, N)                         # free reshape, no HBM pass
    e2 = eps.reshape(B, N)
    scales = jnp.stack(
        [sqrt_alpha_hat_t.astype(jnp.float32),
         sqrt_one_minus_alpha_hat_t.astype(jnp.float32)], axis=1)   # (B, 2)

    tile_b, tile_n, nb, nn, rows_out, lane_out = _pick_tiles(B, N)
    kernel = _make_noise_mse_kernel(B, N, tile_b, tile_n, rows_out, lane_out)

    partials = pl.pallas_call(
        kernel,
        out_shape=jax.ShapeDtypeStruct((nb * rows_out, nn * lane_out), jnp.float32),
        grid_spec=pltpu.PrefetchScalarGridSpec(
            num_scalar_prefetch=0,
            grid=(nb, nn),
            in_specs=[
                pl.BlockSpec((tile_b, 2), lambda bi, ni: (bi, 0)),        # merged scales
                pl.BlockSpec((tile_b, tile_n), lambda bi, ni: (bi, ni)),  # observed_data
                pl.BlockSpec((tile_b, tile_n), lambda bi, ni: (bi, ni)),  # eps
            ],
            out_specs=pl.BlockSpec((rows_out, lane_out), lambda bi, ni: (bi, ni)),
        ),
        compiler_params=pltpu.CompilerParams(
            # No cross-step accumulation -> both axes fully parallel (v7x 2-TC).
            dimension_semantics=("parallel", "parallel"),
            vmem_limit_bytes=32 * 1024 * 1024,
        ),
    )(scales, x2, e2)

    # Tiny cross-tile reduce + mean-normalization in plain JAX.
    return jnp.sum(partials) / jnp.float32(B * K * L)


def make_schedule(num_steps, beta_start, beta_end, schedule):
    """Plain-JAX glue: matches STK_base.__init__ beta/alpha/alpha_hat construction."""
    if schedule == "quad":
        beta = jnp.linspace(beta_start ** 0.5, beta_end ** 0.5, num_steps,
                            dtype=jnp.float32) ** 2
    elif schedule == "linear":
        beta = jnp.linspace(beta_start, beta_end, num_steps, dtype=jnp.float32)
    else:
        raise ValueError(schedule)
    alpha = 1.0 - beta
    alpha_hat = jnp.cumprod(alpha, axis=0)
    return beta, alpha, alpha_hat


def calc_loss(observed_data, alpha_hat, num_steps, key, is_train=1, set_t=0):
    """Mirrors STK_base.calc_loss: sample t (and eps), noise, MSE against eps."""
    B = observed_data.shape[0]
    k_t, k_eps = jax.random.split(key)
    if is_train == 1:
        t = jax.random.randint(k_t, (B,), 0, num_steps)
    else:
        t = jnp.full((B,), set_t, dtype=jnp.int32)
    eps = jax.random.normal(k_eps, observed_data.shape, dtype=observed_data.dtype)
    ah_t = alpha_hat[t]
    return stk_noise_mse_loss(observed_data, eps, jnp.sqrt(ah_t), jnp.sqrt(1.0 - ah_t))


def calc_loss_valid(observed_data, alpha_hat, num_steps, key):
    """Mirrors STK_base.calc_loss_valid (is_train != 1 path)."""
    loss_sum = 0.0
    for t in range(num_steps):
        loss_sum = loss_sum + calc_loss(observed_data, alpha_hat, num_steps, key,
                                        is_train=0, set_t=t)
    return loss_sum / num_steps


if __name__ == "__main__":
    num_steps = 50
    beta_start, beta_end, schedule = 1e-4, 0.5, "quad"
    _, _, alpha_hat = make_schedule(num_steps, beta_start, beta_end, schedule)

    key = jax.random.PRNGKey(0)

    # Correctness vs. a pure-JAX reference on small shapes: the base demo shape,
    # a ragged shape (exercises in-kernel edge masking, nb>1/nn>1), and a shape
    # with several sublane groups per tile (exercises the in-kernel row reduce).
    for (B, K, L) in [(2, 4, 16), (12, 5, 30), (32, 8, 16)]:
        key, k_data, k_t, k_eps = jax.random.split(key, 4)
        observed_data = jax.random.normal(k_data, (B, K, L), dtype=jnp.float32)
        t = jax.random.randint(k_t, (B,), 0, num_steps)
        eps = jax.random.normal(k_eps, (B, K, L), dtype=jnp.float32)

        ah_t = alpha_hat[t]
        sqrt_ah = jnp.sqrt(ah_t)
        sqrt_1m = jnp.sqrt(1.0 - ah_t)

        loss = stk_base_loss = stk_noise_mse_loss(observed_data, eps, sqrt_ah, sqrt_1m)
        loss = jax.block_until_ready(loss)

        # Pure-JAX reference (same identity-denoiser stub).
        noisy_ref = (sqrt_ah[:, None, None] * observed_data
                     + sqrt_1m[:, None, None] * eps)
        loss_ref = jnp.mean((eps - noisy_ref) ** 2)
        assert jnp.allclose(loss, loss_ref, atol=1e-5, rtol=1e-5), (B, K, L, loss, loss_ref)

    # Exercise the full forward()-style training path (random t + eps) once.
    key, k_fwd = jax.random.split(key)
    fwd_loss = calc_loss(observed_data, alpha_hat, num_steps, k_fwd, is_train=1)
    fwd_loss = jax.block_until_ready(fwd_loss)
    assert bool(jnp.isfinite(fwd_loss))

    print("KERNEL_OK")
</pallas_src>

<mosaic_0001>
module attributes {stable_mosaic.version = 11 : i64} {
  func.func @kernel(%arg0: i32, %arg1: i32, %arg2: memref<2x2xf32, #tpu.memory_space<vmem>>, %arg3: memref<2x64xf32, #tpu.memory_space<vmem>>, %arg4: memref<2x64xf32, #tpu.memory_space<vmem>>, %arg5: memref<2x64xf32, #tpu.memory_space<vmem>>) attributes {dimension_semantics = [#tpu.dimension_semantics<parallel>, #tpu.dimension_semantics<parallel>], iteration_bounds = array<i64: 1, 1>, scalar_prefetch = 0 : i64, scratch_operands = 0 : i64, tpu.core_type = #tpu.core_type<tc>, window_params = [{transform_indices = @transform_0, window_bounds = array<i64: 2, 2>}, {transform_indices = @transform_1, window_bounds = array<i64: 2, 64>}, {transform_indices = @transform_2, window_bounds = array<i64: 2, 64>}, {transform_indices = @transform_3, window_bounds = array<i64: 2, 64>}]} {
    %c0 = arith.constant 0 : index
    %c0_0 = arith.constant 0 : index
    %0 = vector.load %arg2[%c0, %c0_0] : memref<2x2xf32, #tpu.memory_space<vmem>>, vector<2x2xf32>
    %1 = vector.extract_strided_slice %0 {offsets = [0, 0], sizes = [2, 1], strides = [1, 1]} : vector<2x2xf32> to vector<2x1xf32>
    %2 = vector.extract_strided_slice %0 {offsets = [0, 1], sizes = [2, 1], strides = [1, 1]} : vector<2x2xf32> to vector<2x1xf32>
    %c0_1 = arith.constant 0 : index
    %c0_2 = arith.constant 0 : index
    %3 = vector.load %arg3[%c0_1, %c0_2] : memref<2x64xf32, #tpu.memory_space<vmem>>, vector<2x64xf32>
    %c0_3 = arith.constant 0 : index
    %c0_4 = arith.constant 0 : index
    %4 = vector.load %arg4[%c0_3, %c0_4] : memref<2x64xf32, #tpu.memory_space<vmem>>, vector<2x64xf32>
    %5 = vector.broadcast %1 : vector<2x1xf32> to vector<2x64xf32>
    %6 = arith.mulf %5, %3 : vector<2x64xf32>
    %7 = vector.broadcast %2 : vector<2x1xf32> to vector<2x64xf32>
    %8 = arith.mulf %7, %4 : vector<2x64xf32>
    %9 = arith.addf %6, %8 : vector<2x64xf32>
    %10 = arith.subf %4, %9 : vector<2x64xf32>
    %11 = arith.mulf %10, %10 : vector<2x64xf32>
    %c0_5 = arith.constant 0 : index
    %c0_6 = arith.constant 0 : index
    %12 = vector.load %arg5[%c0_5, %c0_6] : memref<2x64xf32, #tpu.memory_space<vmem>>, vector<2x64xf32>
    tpu.vector_store %arg5[%c0_5, %c0_6], %11 {strides = array<i32>} : memref<2x64xf32, #tpu.memory_space<vmem>>, vector<2x64xf32>,
    return
  }
  func.func @transform_0(%arg0: i32, %arg1: i32) -> (i32, i32) {
    %c0_i32 = arith.constant 0 : i32
    %c0_i32_0 = arith.constant 0 : i32
    return %arg0, %c0_i32 : i32, i32
  }
  func.func @transform_1(%arg0: i32, %arg1: i32) -> (i32, i32) {
    %c0_i32 = arith.constant 0 : i32
    return %arg0, %arg1 : i32, i32
  }
  func.func @transform_2(%arg0: i32, %arg1: i32) -> (i32, i32) {
    %c0_i32 = arith.constant 0 : i32
    return %arg0, %arg1 : i32, i32
  }
  func.func @transform_3(%arg0: i32, %arg1: i32) -> (i32, i32) {
    %c0_i32 = arith.constant 0 : i32
    return %arg0, %arg1 : i32, i32
  }
}

</mosaic_0001>

<bundles_post_ra>
// kernel: tpu_custom_call.1
= control target key start
LH: loop header
LB: loop body
LE: loop exit
PB: predicated region body
PF: predicated region fallthrough
CT: control target
= control target key end

     0   :  { %8 = vsyncpa [#allocation3], 0  ;;  %s241_s0 = inlined_call_operand.hbm [shape: f32[2,2], index: 0, kind: input, shape index: {}]   ;;  %s242_s1 = inlined_call_operand.hbm [shape: f32[2,64], index: 1, kind: input, shape index: {}]   ;;  %s243_s2 = inlined_call_operand.hbm [shape: f32[2,64], index: 2, kind: input, shape index: {}]   ;;  %s244_s3 = inlined_call_operand.hbm [shape: f32[2,64], index: 3, kind: output, shape index: {}]  }
   0x1   :  { %9 = vsyncpa [#allocation6], 0  ;;  %s27_s14 = sshll.u32 %s242_s1, 4  ;;  %s28_s14 = int_to_ptr.hbm [resolvable:$true] %s27_s14 }
   0x2   :  { %10 = vsyncpa [#allocation4], 0  ;;  %s203_s15 = smov [#allocation5]   ;;  %s16_s19 = sshll.u32 %s241_s0, 4  ;;  %s17_s19 = int_to_ptr.hbm [resolvable:$true] %s16_s19 }
   0x3   :  { %s29_s16 = sshll.u32 %s203_s15, 4  ;;  %s204_s20 = smov [#allocation2]   ;;  %s30_s16 = int_to_ptr.vmem [resolvable:$true] %s29_s16 }
   0x4   :  { %32 = dma.hbm_to_vmem [thread:$0]  %s28_s14, 32, %s30_s16, [#allocation6]  }
   0x5   :  { %s18_s21 = sshll.u32 %s204_s20, 4  ;;  %s38_s24 = sshll.u32 %s243_s2, 4  ;;  %s19_s21 = int_to_ptr.vmem [resolvable:$true] %s18_s21  ;;  %s39_s24 = int_to_ptr.hbm [resolvable:$true] %s38_s24 }
   0x6   :  { %21 = dma.hbm_to_vmem [thread:$0]  %s17_s19, 32, %s19_s21, [#allocation3]  }
   0x7   :  { %s205_s1 = smov [#allocation7]  }
   0x8   :  { %s40_s25 = sshll.u32 %s205_s1, 4  ;;  %s41_s25 = int_to_ptr.vmem [resolvable:$true] %s40_s25 }
   0x9   :  { %43 = dma.hbm_to_vmem [thread:$0]  %s39_s24, 32, %s41_s25, [#allocation6]  }
   0xa   :  { %197 = dma.done.wait [#allocation3], 32  }
   0xb   :  { %198 = vsyncadd [#allocation3], 4294967264 }
   0xc   :  { %199 = dma.done.wait [#allocation6], 64  }
   0xd   :  { %200 = vsyncadd [#allocation6], 4294967232  ;;  %v206_v0 = vmov 0   ;;  %v56_v1 = vld [vmem:[#allocation2] sm:$0x3]  ;;  %v207_v2 = vmov 1  }
   0xe   :  { %99 = vset.pattern.permute.xlu0 %v206_v0  ;;  %v57_v4 = vld [vmem:[#allocation5] sm:$0x3]  ;;  %v58_v5 = vld [vmem:[#allocation7] sm:$0x3]  ;;  %s208_s0 = smov [#allocation8]   ;;  %s82_s28 = sshll.u32 %s244_s3, 4  ;;  %s83_s28 = int_to_ptr.hbm [resolvable:$true] %s82_s28 }
   0xf   :  { %61 = vperm.xlu0 %99, %v56_v1   ;;  %s80_s2 = sshll.u32 %s208_s0, 4  ;;  %vm73_vm0 = vcmask 517120   ;;  %s81_s2 = int_to_ptr.vmem [resolvable:$true] %s80_s2 }
  0x17   :  { %100 = vset.pattern.permute.xlu0 %v207_v2 }
  0x18   :  { %66 = vperm.xlu0 %100, %v56_v1  }
  0x81   :  { %v62_v3 = vpop.permute.xlu0 %61 }
  0x82   :  { %v64_v7 = vmul.f32 %v62_v3, %v57_v4 }
  0x8a   :  { %v67_v6 = vpop.permute.xlu0 %66 }
  0x8b   :  { %v69_v8 = vmul.f32 %v67_v6, %v58_v5 }
  0x8d   :  { %v70_v9 = vadd.f32 %v69_v8, %v64_v7 }
  0x8f   :  { %v71_v10 = vsub.f32 %v58_v5, %v70_v9 }
  0x91   :  { %v72_v11 = vmul.f32 %v71_v10, %v71_v10 }
  0x93   :  { %74 = vst.msk [vmem:[#allocation8] sm:$0x3] %vm73_vm0, %v72_v11 }
  0x94   :  { %85 = dma.vmem_to_hbm [thread:$0]  %s81_s2, 32, %s83_s28, [#allocation4]  }
  0x95   :  { %201 = dma.done.wait [#allocation4], 32  }
  0x96   :  { %202 = vsyncadd [#allocation4], 4294967264 }
  0x97   :  { %90 = vsyncpa [#allocation3], 1 }
  0x98   :  { %91 = vsyncpa [#allocation6], 1 }
  0x99   :  { %92 = vsyncpa [#allocation4], 1 }

</bundles_post_ra>
